<compile_context>
chip_gen: v7x
topology: tpu7x:2x2x1
jax: 0.10.0
libtpu: 0.0.40
codegen_flags: <defaults>
</compile_context>

<pallas_src>
import jax
import jax.numpy as jnp
from jax.experimental import pallas as pl
from jax.experimental.pallas import tpu as pltpu


def csac_forward(x_nchw, w1, b1, w2):
    """x_nchw: (N, C, H, W) f32; w1: (3,3,C,4) HWIO; b1: (4,); w2: (4,1)."""
    N, C, H, W = x_nchw.shape
    HW = H * W
    NC = N * C

    # Flat spatial halo: must be >= W + 1 for the flat-halo trick to be exact
    # (dh=+/-1 taps of edge rows must land in the zero halo). Round up to a
    # multiple of 128 so the original-x slice inside the kernel is lane-aligned.
    PAD = ((W + 1 + 127) // 128) * 128
    assert PAD >= W + 1, "flat-halo padding must cover one spatial row + 1"
    HWP = HW + 2 * PAD

    # Fold conv2 (1x1, 4->1, no bias) into conv1 -> single 3x3 conv C->1.
    w_eff = jnp.tensordot(w1, w2[:, 0], axes=([3], [0]))          # (3, 3, C)
    # Per-row weight table: row r = n*C + c holds the 9 tap weights of channel c.
    w_tbl = jnp.tile(w_eff.reshape(9, C).T, (N, 1)).astype(jnp.float32)  # (NC, 9)
    b_eff = jnp.dot(b1, w2[:, 0]).reshape(1).astype(jnp.float32)  # (1,)

    # (N, C, H, W) -> (N*C, H*W) with a flat zero halo on the spatial axis.
    x2d = x_nchw.reshape(NC, HW)
    x_pad = jnp.pad(x2d, ((0, 0), (PAD, PAD)))                    # (NC, HWP)

    def kernel(xp_ref, w_ref, b_ref, out_ref, acc_ref, gate_ref):
        # Hoisted ReLU: one pass over the whole padded block (VPU).
        y = jnp.maximum(xp_ref[...], 0.0)                         # (NC, HWP)
        wtab = w_ref[...]                                         # (NC, 9)

        # Per-tap sublane-vectorized FMAs over all N*C rows, grouped by the
        # width offset dw so the boundary masks are applied once per group.
        acc_l = acc_c = acc_r = None
        for kh in range(3):
            for kw in range(3):
                dw = kw - 1
                base = PAD + (kh - 1) * W + dw
                tap = kh * 3 + kw
                term = wtab[:, tap:tap + 1] * y[:, base:base + HW]  # (NC, HW)
                if dw == -1:
                    acc_l = term if acc_l is None else acc_l + term
                elif dw == 0:
                    acc_c = term if acc_c is None else acc_c + term
                else:
                    acc_r = term if acc_r is None else acc_r + term

        # Width-direction boundary masks (h-direction handled by the halo).
        col = jax.lax.broadcasted_iota(jnp.int32, (NC, HW), 1) % W
        acc = (acc_c
               + jnp.where(col >= 1, acc_l, 0.0)
               + jnp.where(col <= W - 2, acc_r, 0.0))              # (NC, HW)
        acc_ref[...] = acc

        # Per-batch channel reduction (XLU) -> bias -> sigmoid (exp on EUP),
        # then sublane-broadcast the gate back to that batch's C rows.
        for n in range(N):
            part = acc_ref[n * C:(n + 1) * C, :]                   # (C, HW)
            logit = jnp.sum(part, axis=0, keepdims=True) + b_ref[0]
            gate = jax.nn.sigmoid(logit)                           # (1, HW)
            gate_ref[n * C:(n + 1) * C, :] = jnp.broadcast_to(gate, (C, HW))

        # Single unmasked full-tile gating multiply + store.
        x_orig = xp_ref[:, PAD:PAD + HW]          # lane-aligned (PAD % 128 == 0)
        out_ref[...] = (x_orig * gate_ref[...]).astype(out_ref.dtype)

    out2d = pl.pallas_call(
        kernel,
        out_shape=jax.ShapeDtypeStruct((NC, HW), x_nchw.dtype),
        grid_spec=pltpu.PrefetchScalarGridSpec(
            num_scalar_prefetch=0,
            grid=(1,),
            in_specs=[
                pl.BlockSpec((NC, HWP), lambda i: (0, 0)),          # padded x
                pl.BlockSpec((NC, 9), lambda i: (0, 0)),            # weight table
                pl.BlockSpec(memory_space=pltpu.MemorySpace.SMEM),  # bias scalar
            ],
            out_specs=pl.BlockSpec((NC, HW), lambda i: (0, 0)),
            scratch_shapes=[
                pltpu.VMEM((NC, HW), jnp.float32),   # acc scratch
                pltpu.VMEM((NC, HW), jnp.float32),   # gate scratch
            ],
        ),
        compiler_params=pltpu.CompilerParams(
            dimension_semantics=("arbitrary",)),
    )(x_pad, w_tbl, b_eff)

    return out2d.reshape(N, C, H, W)


def csac_reference(x_nchw, w1, b1, w2):
    """Pure-JAX reference matching the PyTorch forward (NCHW)."""
    y = jnp.maximum(x_nchw, 0.0)
    y = jax.lax.conv_general_dilated(
        y, w1, window_strides=(1, 1), padding=((1, 1), (1, 1)),
        dimension_numbers=("NCHW", "HWIO", "NCHW"))
    y = y + b1.reshape(1, 4, 1, 1)
    y2 = jnp.einsum("nchw,co->nohw", y, w2)
    s = jax.nn.sigmoid(y2)
    return x_nchw * s


if __name__ == "__main__":
    key = jax.random.PRNGKey(0)
    k_x, k_w1, k_w2 = jax.random.split(key, 3)

    N, C, H, W = 2, 4, 16, 16
    x = jax.random.normal(k_x, (N, C, H, W), jnp.float32)

    # Deterministic parameter init (shapes from CSAC.__init__):
    #   conv1.weight: (4, C, 3, 3) -> stored HWIO (3, 3, C, 4)
    #   conv1.bias:   (4,) set to 0 by nn.init.constant_
    #   conv2.weight: (1, 4, 1, 1) -> stored (4, 1); conv2 has no bias
    bound1 = 1.0 / float(C * 3 * 3) ** 0.5
    w1 = jax.random.uniform(k_w1, (3, 3, C, 4), jnp.float32, -bound1, bound1)
    b1 = jnp.zeros((4,), jnp.float32)
    bound2 = 1.0 / float(4) ** 0.5
    w2 = jax.random.uniform(k_w2, (4, 1), jnp.float32, -bound2, bound2)

    out = jax.block_until_ready(csac_forward(x, w1, b1, w2))
    ref = csac_reference(x, w1, b1, w2)
    assert out.shape == (N, C, H, W)
    assert jnp.allclose(out, ref, atol=1e-5, rtol=1e-5), "kernel mismatch vs reference"
    print("KERNEL_OK")
</pallas_src>

<mosaic_0001>
module attributes {stable_mosaic.version = 11 : i64} {
  func.func @kernel(%arg0: i32, %arg1: memref<8x512xf32, #tpu.memory_space<vmem>>, %arg2: memref<8x9xf32, #tpu.memory_space<vmem>>, %arg3: memref<1xf32, #tpu.memory_space<smem>>, %arg4: memref<8x256xf32, #tpu.memory_space<vmem>>, %arg5: memref<8x256xf32, #tpu.memory_space<vmem>>, %arg6: memref<8x256xf32, #tpu.memory_space<vmem>>) attributes {dimension_semantics = [#tpu.dimension_semantics<arbitrary>], iteration_bounds = array<i64: 1>, scalar_prefetch = 0 : i64, scratch_operands = 2 : i64, tpu.core_type = #tpu.core_type<tc>, window_params = [{pipeline_mode = #tpu.pipeline_mode<synchronous>, transform_indices = @transform_0, window_bounds = array<i64: 8, 512>}, {pipeline_mode = #tpu.pipeline_mode<synchronous>, transform_indices = @transform_1, window_bounds = array<i64: 8, 9>}, {transform_indices = @transform_2, window_bounds = array<i64: 1>}, {pipeline_mode = #tpu.pipeline_mode<synchronous>, transform_indices = @transform_3, window_bounds = array<i64: 8, 256>}]} {
    %c0 = arith.constant 0 : index
    %c0_0 = arith.constant 0 : index
    %0 = vector.load %arg1[%c0, %c0_0] : memref<8x512xf32, #tpu.memory_space<vmem>>, vector<8x512xf32>
    %cst = arith.constant 0.000000e+00 : f32
    %1 = vector.broadcast %cst : f32 to vector<8x512xf32>
    %2 = arith.maximumf %0, %1 : vector<8x512xf32>
    %c0_1 = arith.constant 0 : index
    %c0_2 = arith.constant 0 : index
    %3 = vector.load %arg2[%c0_1, %c0_2] : memref<8x9xf32, #tpu.memory_space<vmem>>, vector<8x9xf32>
    %4 = vector.extract_strided_slice %3 {offsets = [0, 0], sizes = [8, 1], strides = [1, 1]} : vector<8x9xf32> to vector<8x1xf32>
    %5 = vector.extract_strided_slice %2 {offsets = [0, 111], sizes = [8, 256], strides = [1, 1]} : vector<8x512xf32> to vector<8x256xf32>
    %6 = vector.broadcast %4 : vector<8x1xf32> to vector<8x256xf32>
    %7 = arith.mulf %6, %5 : vector<8x256xf32>
    %8 = vector.extract_strided_slice %3 {offsets = [0, 1], sizes = [8, 1], strides = [1, 1]} : vector<8x9xf32> to vector<8x1xf32>
    %9 = vector.extract_strided_slice %2 {offsets = [0, 112], sizes = [8, 256], strides = [1, 1]} : vector<8x512xf32> to vector<8x256xf32>
    %10 = vector.broadcast %8 : vector<8x1xf32> to vector<8x256xf32>
    %11 = arith.mulf %10, %9 : vector<8x256xf32>
    %12 = vector.extract_strided_slice %3 {offsets = [0, 2], sizes = [8, 1], strides = [1, 1]} : vector<8x9xf32> to vector<8x1xf32>
    %13 = vector.extract_strided_slice %2 {offsets = [0, 113], sizes = [8, 256], strides = [1, 1]} : vector<8x512xf32> to vector<8x256xf32>
    %14 = vector.broadcast %12 : vector<8x1xf32> to vector<8x256xf32>
    %15 = arith.mulf %14, %13 : vector<8x256xf32>
    %16 = vector.extract_strided_slice %3 {offsets = [0, 3], sizes = [8, 1], strides = [1, 1]} : vector<8x9xf32> to vector<8x1xf32>
    %17 = vector.extract_strided_slice %2 {offsets = [0, 127], sizes = [8, 256], strides = [1, 1]} : vector<8x512xf32> to vector<8x256xf32>
    %18 = vector.broadcast %16 : vector<8x1xf32> to vector<8x256xf32>
    %19 = arith.mulf %18, %17 : vector<8x256xf32>
    %20 = arith.addf %7, %19 : vector<8x256xf32>
    %21 = vector.extract_strided_slice %3 {offsets = [0, 4], sizes = [8, 1], strides = [1, 1]} : vector<8x9xf32> to vector<8x1xf32>
    %22 = vector.extract_strided_slice %2 {offsets = [0, 128], sizes = [8, 256], strides = [1, 1]} : vector<8x512xf32> to vector<8x256xf32>
    %23 = vector.broadcast %21 : vector<8x1xf32> to vector<8x256xf32>
    %24 = arith.mulf %23, %22 : vector<8x256xf32>
    %25 = arith.addf %11, %24 : vector<8x256xf32>
    %26 = vector.extract_strided_slice %3 {offsets = [0, 5], sizes = [8, 1], strides = [1, 1]} : vector<8x9xf32> to vector<8x1xf32>
    %27 = vector.extract_strided_slice %2 {offsets = [0, 129], sizes = [8, 256], strides = [1, 1]} : vector<8x512xf32> to vector<8x256xf32>
    %28 = vector.broadcast %26 : vector<8x1xf32> to vector<8x256xf32>
    %29 = arith.mulf %28, %27 : vector<8x256xf32>
    %30 = arith.addf %15, %29 : vector<8x256xf32>
    %31 = vector.extract_strided_slice %3 {offsets = [0, 6], sizes = [8, 1], strides = [1, 1]} : vector<8x9xf32> to vector<8x1xf32>
    %32 = vector.extract_strided_slice %2 {offsets = [0, 143], sizes = [8, 256], strides = [1, 1]} : vector<8x512xf32> to vector<8x256xf32>
    %33 = vector.broadcast %31 : vector<8x1xf32> to vector<8x256xf32>
    %34 = arith.mulf %33, %32 : vector<8x256xf32>
    %35 = arith.addf %20, %34 : vector<8x256xf32>
    %36 = vector.extract_strided_slice %3 {offsets = [0, 7], sizes = [8, 1], strides = [1, 1]} : vector<8x9xf32> to vector<8x1xf32>
    %37 = vector.extract_strided_slice %2 {offsets = [0, 144], sizes = [8, 256], strides = [1, 1]} : vector<8x512xf32> to vector<8x256xf32>
    %38 = vector.broadcast %36 : vector<8x1xf32> to vector<8x256xf32>
    %39 = arith.mulf %38, %37 : vector<8x256xf32>
    %40 = arith.addf %25, %39 : vector<8x256xf32>
    %41 = vector.extract_strided_slice %3 {offsets = [0, 8], sizes = [8, 1], strides = [1, 1]} : vector<8x9xf32> to vector<8x1xf32>
    %42 = vector.extract_strided_slice %2 {offsets = [0, 145], sizes = [8, 256], strides = [1, 1]} : vector<8x512xf32> to vector<8x256xf32>
    %43 = vector.broadcast %41 : vector<8x1xf32> to vector<8x256xf32>
    %44 = arith.mulf %43, %42 : vector<8x256xf32>
    %45 = arith.addf %30, %44 : vector<8x256xf32>
    %46 = tpu.iota {dimensions = array<i32: 1>} : vector<8x256xi32>
    %c16_i32 = arith.constant 16 : i32
    %c0_i32 = arith.constant 0 : i32
    %47 = arith.cmpi eq, %c16_i32, %c0_i32 : i32
    %c1_i32 = arith.constant 1 : i32
    %48 = arith.select %47, %c1_i32, %c16_i32 : i32
    %49 = vector.broadcast %48 : i32 to vector<8x256xi32>
    %50 = arith.remsi %46, %49 : vector<8x256xi32>
    %c0_i32_3 = arith.constant 0 : i32
    %51 = vector.broadcast %c0_i32_3 : i32 to vector<8x256xi32>
    %52 = arith.cmpi ne, %50, %51 : vector<8x256xi32>
    %c0_i32_4 = arith.constant 0 : i32
    %53 = vector.broadcast %c0_i32_4 : i32 to vector<8x256xi32>
    %54 = arith.cmpi slt, %50, %53 : vector<8x256xi32>
    %c0_i32_5 = arith.constant 0 : i32
    %55 = arith.cmpi slt, %48, %c0_i32_5 : i32
    %56 = vector.broadcast %55 : i1 to vector<8x256xi1>
    %57 = vector.broadcast %56 : vector<8x256xi1> to vector<8x256xi1>
    %58 = arith.xori %54, %57 : vector<8x256xi1>
    %59 = arith.andi %58, %52 : vector<8x256xi1>
    %60 = vector.broadcast %48 : i32 to vector<8x256xi32>
    %61 = arith.addi %50, %60 : vector<8x256xi32>
    %62 = arith.select %59, %61, %50 : vector<8x256xi1>, vector<8x256xi32>
    %c1_i32_6 = arith.constant 1 : i32
    %63 = vector.broadcast %c1_i32_6 : i32 to vector<8x256xi32>
    %64 = arith.cmpi sge, %62, %63 : vector<8x256xi32>
    %cst_7 = arith.constant 0.000000e+00 : f32
    %65 = vector.broadcast %cst_7 : f32 to vector<8x256xf32>
    %66 = arith.select %64, %35, %65 : vector<8x256xi1>, vector<8x256xf32>
    %67 = arith.addf %40, %66 : vector<8x256xf32>
    %c14_i32 = arith.constant 14 : i32
    %68 = vector.broadcast %c14_i32 : i32 to vector<8x256xi32>
    %69 = arith.cmpi sle, %62, %68 : vector<8x256xi32>
    %cst_8 = arith.constant 0.000000e+00 : f32
    %70 = vector.broadcast %cst_8 : f32 to vector<8x256xf32>
    %71 = arith.select %69, %45, %70 : vector<8x256xi1>, vector<8x256xf32>
    %72 = arith.addf %67, %71 : vector<8x256xf32>
    %c0_9 = arith.constant 0 : index
    %c0_10 = arith.constant 0 : index
    %73 = vector.load %arg5[%c0_9, %c0_10] : memref<8x256xf32, #tpu.memory_space<vmem>>, vector<8x256xf32>
    tpu.vector_store %arg5[%c0_9, %c0_10], %72 {strides = array<i32>} : memref<8x256xf32, #tpu.memory_space<vmem>>, vector<8x256xf32>,
    %c0_11 = arith.constant 0 : index
    %c0_12 = arith.constant 0 : index
    %74 = vector.load %arg5[%c0_11, %c0_12] : memref<8x256xf32, #tpu.memory_space<vmem>>, vector<4x256xf32>
    %cst_13 = arith.constant dense<0.000000e+00> : vector<256xf32>
    %75 = vector.multi_reduction <add>, %74, %cst_13 [0] : vector<4x256xf32> to vector<256xf32>
    %76 = vector.shape_cast %75 : vector<256xf32> to vector<1x256xf32>
    %c0_14 = arith.constant 0 : index
    %77 = memref.load %arg3[%c0_14] : memref<1xf32, #tpu.memory_space<smem>>
    %78 = vector.broadcast %77 : f32 to vector<1x256xf32>
    %79 = arith.addf %76, %78 : vector<1x256xf32>
    %80 = arith.negf %79 : vector<1x256xf32>
    %81 = math.exp %80 : vector<1x256xf32>
    %cst_15 = arith.constant 1.000000e+00 : f32
    %82 = vector.broadcast %cst_15 : f32 to vector<1x256xf32>
    %83 = arith.addf %82, %81 : vector<1x256xf32>
    %84 = arith.divf %82, %83 : vector<1x256xf32>
    %85 = vector.shape_cast %84 : vector<1x256xf32> to vector<1x256xf32>
    %86 = vector.broadcast %85 : vector<1x256xf32> to vector<4x256xf32>
    %c0_16 = arith.constant 0 : index
    %c0_17 = arith.constant 0 : index
    %87 = vector.load %arg6[%c0_16, %c0_17] : memref<8x256xf32, #tpu.memory_space<vmem>>, vector<4x256xf32>
    tpu.vector_store %arg6[%c0_16, %c0_17], %86 {strides = array<i32>} : memref<8x256xf32, #tpu.memory_space<vmem>>, vector<4x256xf32>,
    %c4 = arith.constant 4 : index
    %c0_18 = arith.constant 0 : index
    %88 = vector.load %arg5[%c4, %c0_18] : memref<8x256xf32, #tpu.memory_space<vmem>>, vector<4x256xf32>
    %cst_19 = arith.constant dense<0.000000e+00> : vector<256xf32>
    %89 = vector.multi_reduction <add>, %88, %cst_19 [0] : vector<4x256xf32> to vector<256xf32>
    %90 = vector.shape_cast %89 : vector<256xf32> to vector<1x256xf32>
    %c0_20 = arith.constant 0 : index
    %91 = memref.load %arg3[%c0_20] : memref<1xf32, #tpu.memory_space<smem>>
    %92 = vector.broadcast %91 : f32 to vector<1x256xf32>
    %93 = arith.addf %90, %92 : vector<1x256xf32>
    %94 = arith.negf %93 : vector<1x256xf32>
    %95 = math.exp %94 : vector<1x256xf32>
    %cst_21 = arith.constant 1.000000e+00 : f32
    %96 = vector.broadcast %cst_21 : f32 to vector<1x256xf32>
    %97 = arith.addf %96, %95 : vector<1x256xf32>
    %98 = arith.divf %96, %97 : vector<1x256xf32>
    %99 = vector.shape_cast %98 : vector<1x256xf32> to vector<1x256xf32>
    %100 = vector.broadcast %99 : vector<1x256xf32> to vector<4x256xf32>
    %c4_22 = arith.constant 4 : index
    %c0_23 = arith.constant 0 : index
    %101 = vector.load %arg6[%c4_22, %c0_23] : memref<8x256xf32, #tpu.memory_space<vmem>>, vector<4x256xf32>
    tpu.vector_store %arg6[%c4_22, %c0_23], %100 {strides = array<i32>} : memref<8x256xf32, #tpu.memory_space<vmem>>, vector<4x256xf32>,
    %c0_24 = arith.constant 0 : index
    %c128 = arith.constant 128 : index
    %102 = vector.load %arg1[%c0_24, %c128] : memref<8x512xf32, #tpu.memory_space<vmem>>, vector<8x256xf32>
    %c0_25 = arith.constant 0 : index
    %c0_26 = arith.constant 0 : index
    %103 = vector.load %arg6[%c0_25, %c0_26] : memref<8x256xf32, #tpu.memory_space<vmem>>, vector<8x256xf32>
    %104 = arith.mulf %102, %103 : vector<8x256xf32>
    %c0_27 = arith.constant 0 : index
    %c0_28 = arith.constant 0 : index
    %105 = vector.load %arg4[%c0_27, %c0_28] : memref<8x256xf32, #tpu.memory_space<vmem>>, vector<8x256xf32>
    tpu.vector_store %arg4[%c0_27, %c0_28], %104 {strides = array<i32>} : memref<8x256xf32, #tpu.memory_space<vmem>>, vector<8x256xf32>,
    return
  }
  func.func @transform_0(%arg0: i32) -> (i32, i32) {
    %c0_i32 = arith.constant 0 : i32
    %c0_i32_0 = arith.constant 0 : i32
    %c0_i32_1 = arith.constant 0 : i32
    return %c0_i32, %c0_i32_0 : i32, i32
  }
  func.func @transform_1(%arg0: i32) -> (i32, i32) {
    %c0_i32 = arith.constant 0 : i32
    %c0_i32_0 = arith.constant 0 : i32
    %c0_i32_1 = arith.constant 0 : i32
    return %c0_i32, %c0_i32_0 : i32, i32
  }
  func.func @transform_2(%arg0: i32) -> i32 {
    %c0_i32 = arith.constant 0 : i32
    %c0_i32_0 = arith.constant 0 : i32
    return %c0_i32 : i32
  }
  func.func @transform_3(%arg0: i32) -> (i32, i32) {
    %c0_i32 = arith.constant 0 : i32
    %c0_i32_0 = arith.constant 0 : i32
    %c0_i32_1 = arith.constant 0 : i32
    return %c0_i32, %c0_i32_0 : i32, i32
  }
}

</mosaic_0001>

<bundles_post_ra>
// kernel: tpu_custom_call.1
= control target key start
LH: loop header
LB: loop body
LE: loop exit
PB: predicated region body
PF: predicated region fallthrough
CT: control target
= control target key end

     0   :  { %9 = vsyncpa [#allocation6], 0  ;;  %s702_s0 = inlined_call_operand.hbm [shape: f32[8,512], index: 0, kind: input, shape index: {}]   ;;  %s703_s1 = inlined_call_operand.hbm [shape: f32[8,9], index: 1, kind: input, shape index: {}]   ;;  %s704_s2 = inlined_call_operand.<no memory space> [shape: f32[1], index: 2, kind: input, shape index: {}]   ;;  %s705_s3 = inlined_call_operand.hbm [shape: f32[8,256], index: 3, kind: output, shape index: {}]  }
   0x1   :  { %10 = vsyncpa [#allocation9], 0 }
   0x2   :  { %11 = vsyncpa [#allocation7], 0  ;;  %s535_s12 = smov [#allocation5]   ;;  %s536_s14 = smov [#allocation8]  }
   0x3   :  { %s18_s13 = sshll.u32 %s535_s12, 4  ;;  %s28_s15 = sshll.u32 %s536_s14, 4  ;;  %s19_s13 = int_to_ptr.vmem [resolvable:$true] %s18_s13  ;;  %s29_s15 = int_to_ptr.vmem [resolvable:$true] %s28_s15 }
   0x4   :  { %s463_s18 = scalar_lea.hbm %s702_s0, 512 }
   0x5   :  { %p464_p0 = scmp.ne.s32.totalorder %s702_s0, %s463_s18  ;;  %p467_p1 = scmp.lt.u32.totalorder %s463_s18, %s702_s0 }
   0x7   :  { %p469_p2 = pnand %p467_p1, %p464_p0 }
   0x9   :  { %472 = shalt.err (!%p469_p2)
}
   0xa   :  { %s473_s23 = scalar_lea.vmem %s19_s13, 512  ;;  %p478_p4 = scmp.lt.s32.totalorder %s19_s13, %s19_s13 }
   0xb   :  { %p474_p3 = scmp.ne.s32.totalorder %s19_s13, %s473_s23  ;;  %p479_p5 = scmp.lt.s32.totalorder %s473_s23, %s473_s23 }
   0xd   :  { %p480_p6 = por %p479_p5, %p478_p4 }
   0xf   :  { %p481_p7 = pnand %p480_p6, %p474_p3 }
  0x11   :  { %484 = shalt.err (!%p481_p7)
}
  0x12   :  { %21 = dma.hbm_to_vmem [thread:$0]  %s702_s0, 512, %s19_s13, [#allocation6]  }
  0x13   :  { %s485_s28 = scalar_lea.hbm %s703_s1, 128 }
  0x14   :  { %p486_p8 = scmp.ne.s32.totalorder %s703_s1, %s485_s28  ;;  %p489_p9 = scmp.lt.u32.totalorder %s485_s28, %s703_s1 }
  0x16   :  { %p491_p10 = pnand %p489_p9, %p486_p8 }
  0x18   :  { %494 = shalt.err (!%p491_p10)
}
  0x19   :  { %s495_s6 = scalar_lea.vmem %s29_s15, 128  ;;  %p500_p12 = scmp.lt.s32.totalorder %s29_s15, %s29_s15 }
  0x1a   :  { %p496_p11 = scmp.ne.s32.totalorder %s29_s15, %s495_s6  ;;  %p501_p13 = scmp.lt.s32.totalorder %s495_s6, %s495_s6 }
  0x1c   :  { %p502_p0 = por %p501_p13, %p500_p12 }
  0x1e   :  { %p503_p1 = pnand %p502_p0, %p496_p11 }
  0x20   :  { %506 = shalt.err (!%p503_p1)
}
  0x21   :  { %31 = dma.hbm_to_vmem [thread:$0]  %s703_s1, 128, %s29_s15, [#allocation9]  }
  0x22   :  { %529 = dma.done.wait [#allocation6], 512  }
  0x23   :  { %530 = vsyncadd [#allocation6], 4294966784 }
  0x24   :  { %531 = dma.done.wait [#allocation9], 128  }
  0x25   :  { %532 = vsyncadd [#allocation9], 4294967168  ;;  %v537_v0 = vmov 3   ;;  %v538_v1 = vmov 6   ;;  %v596_v2 = vld [vmem:[#allocation8] sm:$0xff]  ;;  %v539_v3 = vmov 5  }
  0x26   :  { %437 = vset.pattern.permute.xlu0 %v537_v0  ;;  %439 = vset.pattern.permute.xlu1 %v538_v1  ;;  %v540_v4 = vmov 8   ;;  %v541_v5 = vmov 0   ;;  %v542_v6 = vmov 2   ;;  %v543_v7 = vmov 4   ;;  %v40_v9 = vld [vmem:[#allocation5] sm:$0xff]  ;;  %v604_v10 = vld [vmem:[#allocation5 + $0x10] sm:$0xff] }
  0x27   :  { %72 = vperm.xlu0 %437, %v596_v2   ;;  %140 = vperm.xlu1 %439, %v596_v2   ;;  %v544_v8 = vmov 7   ;;  %v606_v11 = vmax.f32 %v40_v9, 0.0  ;;  %v609_v12 = vmax.f32 %v604_v10, 0.0  ;;  %v611_v13 = vld [vmem:[#allocation5 + $0x8] sm:$0xff]  ;;  %s545_s1 = smov 112   ;;  %v43_v21 = vld [vmem:[#allocation5 + $0x18] sm:$0xff] }
  0x28   :  { %v614_v15 = vmax.f32 %v611_v13, 0.0  ;;  %v626_v25 = vmax.f32 %v43_v21, 0.0  ;;  %s546_s8 = smov 96   ;;  %v547_v33 = vmov 1   ;;  %vm87_vm0 = vcmask 916480   ;;  %s548_s9 = smov 17  }
  0x29   :  { %vm155_vm1 = vcmask 785408   ;;  %s549_s10 = smov 15   ;;  %vm250_vm2 = vcmask 138240   ;;  %vm281_vm5 = vcmask 121856   ;;  %s550_s11 = smov 16   ;;  %vm310_vm8 = vcmask 130048  }
  0x2a   :  { %vm319_vm9 = vcmask 1043456  }
  0x2b   :  { %438 = vset.pattern.permute.xlu0 %v539_v3  ;;  %440 = vset.pattern.permute.xlu1 %v540_v4 }
  0x2c   :  { %116 = vperm.xlu0 %438, %v596_v2   ;;  %189 = vperm.xlu1 %440, %v596_v2  }
  0x30   :  { %441 = vset.pattern.permute.xlu1 %v541_v5  ;;  %442 = vset.pattern.permute.xlu0 %v542_v6 }
  0x31   :  { %51 = vperm.xlu1 %441, %v596_v2   ;;  %65 = vperm.xlu0 %442, %v596_v2  }
  0x35   :  { %443 = vset.pattern.permute.xlu0 %v543_v7  ;;  %444 = vset.pattern.permute.xlu1 %v544_v8 }
  0xa6   :  { %v73_v14 = vpop.permute.xlu0 %72  ;;  %v141_v20 = vpop.permute.xlu1 %140 }
  0xa7   :  { %v75_v16 = vmul.f32 %v73_v14, %v606_v11  ;;  %v77_v17 = vmul.f32 %v73_v14, %v609_v12  ;;  %v76_v18 = vmul.f32 %v73_v14, %v614_v15  ;;  %v143_v24 = vmul.f32 %v141_v20, %v614_v15 }
  0xa8   :  { %v145_v26 = vmul.f32 %v141_v20, %v626_v25  ;;  %v144_v29 = vmul.f32 %v141_v20, %v609_v12 }
  0xa9   :  { %85 = vrot.lane.b32.xlu0 %v77_v17, %s545_s1  ;;  %81 = vrot.lane.b32.xlu1 %v75_v16, %s545_s1 }
  0xab   :  { %v117_v19 = vpop.permute.xlu0 %116  ;;  %v190_v28 = vpop.permute.xlu1 %189 }
  0xac   :  { %v120_v22 = vmul.f32 %v117_v19, %v609_v12  ;;  %v119_v23 = vmul.f32 %v117_v19, %v614_v15  ;;  %v121_v27 = vmul.f32 %v117_v19, %v626_v25  ;;  %v193_v30 = vmul.f32 %v190_v28, %v609_v12 }
  0xad   :  { %83 = vrot.lane.b32.xlu1 %v76_v18, %s545_s1  ;;  %v192_v31 = vmul.f32 %v190_v28, %v614_v15  ;;  %v194_v32 = vmul.f32 %v190_v28, %v626_v25 }
  0xae   :  { %127 = vrot.lane.b32.xlu0 %v120_v22, %s545_s1 }
  0xb0   :  { %v52_v34 = vpop.permute.xlu1 %51  ;;  %v66_v35 = vpop.permute.xlu0 %65 }
  0xb1   :  { %125 = vrot.lane.b32.xlu1 %v119_v23, %s545_s1  ;;  %v56_v43 = vmul.f32 %v52_v34, %v609_v12  ;;  %v68_v47 = vmul.f32 %v66_v35, %v606_v11  ;;  %v54_v50 = vmul.f32 %v52_v34, %v606_v11  ;;  %v55_v57 = vmul.f32 %v52_v34, %v614_v15 }
  0xb2   :  { %149 = vrot.lane.b32.xlu0 %v143_v24, %s546_s8  ;;  %v69_v60 = vmul.f32 %v66_v35, %v614_v15  ;;  %v70_v5 = vmul.f32 %v66_v35, %v609_v12 }
  0xb5   :  { %129 = vrot.lane.b32.xlu1 %v121_v27, %s545_s1 }
  0xb6   :  { %153 = vrot.lane.b32.xlu0 %v145_v26, %s546_s8 }
  0xb9   :  { %151 = vrot.lane.b32.xlu1 %v144_v29, %s546_s8 }
  0xba   :  { %200 = vrot.lane.b32.xlu0 %v193_v30, %s546_s8 }
  0xbd   :  { %198 = vrot.lane.b32.xlu1 %v192_v31, %s546_s8 }
  0xbe   :  { %97 = vperm.xlu0 %443, %v596_v2  }
  0xc1   :  { %202 = vrot.lane.b32.xlu1 %v194_v32, %s546_s8 }
  0xc2   :  { %446 = vset.pattern.permute.xlu0 %v540_v4 }
  0xc5   :  { %165 = vperm.xlu1 %444, %v596_v2  }
  0xc9   :  { %445 = vset.pattern.permute.xlu1 %v547_v33 }
 0x11b   :  { %v86_v36 = vpop.permute.xlu0 %85  ;;  %v82_v37 = vpop.permute.xlu1 %81 }
 0x11c   :  { %v95_v45 = vadd.f32 %v86_v36, %v56_v43 }
 0x11f   :  { %v84_v38 = vpop.permute.xlu1 %83 }
 0x120   :  { %v128_v39 = vpop.permute.xlu0 %127  ;;  %v88_v48 = vsel %vm87_vm0, %v82_v37, %v84_v38  ;;  %v89_v53 = vsel %vm87_vm0, %v84_v38, %v86_v36 }
 0x121   :  { %v93_v54 = vadd.f32 %v88_v48, %v54_v50  ;;  %v94_v63 = vadd.f32 %v89_v53, %v55_v57 }
 0x123   :  { %v126_v40 = vpop.permute.xlu1 %125 }
 0x124   :  { %v150_v41 = vpop.permute.xlu0 %149  ;;  %v136_v52 = vadd.f32 %v126_v40, %v68_v47  ;;  %v131_v58 = vsel %vm87_vm0, %v126_v40, %v128_v39 }
 0x125   :  { %v161_v61 = vadd.f32 %v150_v41, %v93_v54  ;;  %v137_v1 = vadd.f32 %v131_v58, %v69_v60 }
 0x127   :  { %v130_v42 = vpop.permute.xlu1 %129 }
 0x128   :  { %v154_v44 = vpop.permute.xlu0 %153  ;;  %v132_v3 = vsel %vm87_vm0, %v128_v39, %v130_v42 }
 0x129   :  { %v138_v9 = vadd.f32 %v132_v3, %v70_v5 }
 0x12b   :  { %v152_v46 = vpop.permute.xlu1 %151 }
 0x12c   :  { %v157_v49 = vsel %vm155_vm1, %v152_v46, %v154_v44  ;;  %v201_v55 = vpop.permute.xlu0 %200  ;;  %v156_v62 = vsel %vm155_vm1, %v150_v41, %v152_v46 }
 0x12d   :  { %v163_v51 = vadd.f32 %v157_v49, %v95_v45  ;;  %v162_v6 = vadd.f32 %v156_v62, %v94_v63 }
 0x12f   :  { %248 = vrot.lane.b32.xlu1 %v163_v51, %s548_s9  ;;  %v199_v56 = vpop.permute.xlu1 %198 }
 0x130   :  { %v209_v59 = vadd.f32 %v199_v56, %v136_v52  ;;  %v204_v0 = vsel %vm155_vm1, %v199_v56, %v201_v55 }
 0x131   :  { %v210_v7 = vadd.f32 %v204_v0, %v137_v1 }
 0x132   :  { %275 = vrot.lane.b32.xlu0 %v209_v59, %s549_s10 }
 0x133   :  { %v203_v4 = vpop.permute.xlu1 %202  ;;  %244 = vrot.lane.b32.xlu1 %v161_v61, %s548_s9 }
 0x134   :  { %v205_v8 = vsel %vm155_vm1, %v201_v55, %v203_v4 }
 0x135   :  { %v211_v14 = vadd.f32 %v205_v8, %v138_v9 }
 0x136   :  { %246 = vrot.lane.b32.xlu0 %v162_v6, %s548_s9 }
 0x137   :  { %277 = vrot.lane.b32.xlu1 %v210_v7, %s549_s10 }
 0x13a   :  { %279 = vrot.lane.b32.xlu0 %v211_v14, %s549_s10 }
 0x13b   :  { %58 = vperm.xlu1 %445, %v596_v2   ;;  %v212_v2 = vlaneseq }
 0x13d   :  { %v98_v16 = vpop.permute.xlu0 %97  ;;  %v213_v23 = vand.u32 127, %v212_v2 }
 0x13e   :  { %v100_v17 = vmul.f32 %v98_v16, %v614_v15  ;;  %v101_v18 = vmul.f32 %v98_v16, %v609_v12 }
 0x13f   :  { %v214_v24 = vadd.s32 128, %v213_v23  ;;  %v219_v28 = vand.u32 15, %v213_v23 }
 0x140   :  { %104 = vrot.lane.b32.xlu0 %v100_v17, %s545_s1  ;;  %106 = vrot.lane.b32.xlu1 %v101_v18, %s545_s1 }
 0x141   :  { %v226_v27 = vand.u32 15, %v214_v24  ;;  %vm239_vm4 = vcmp.ge.s32.totalorder %v219_v28, 1  ;;  %vm270_vm7 = vcmp.le.s32.totalorder %v219_v28, 14 }
 0x143   :  { %vm240_vm3 = vcmp.ge.s32.totalorder %v226_v27, 1  ;;  %vm271_vm6 = vcmp.le.s32.totalorder %v226_v27, 14 }
 0x144   :  { %v166_v19 = vpop.permute.xlu1 %165 }
 0x145   :  { %v168_v20 = vmul.f32 %v166_v19, %v614_v15  ;;  %v169_v21 = vmul.f32 %v166_v19, %v609_v12  ;;  %v170_v22 = vmul.f32 %v166_v19, %v626_v25 }
 0x147   :  { %174 = vrot.lane.b32.xlu0 %v168_v20, %s546_s8  ;;  %176 = vrot.lane.b32.xlu1 %v169_v21, %s546_s8 }
 0x14b   :  { %178 = vrot.lane.b32.xlu0 %v170_v22, %s546_s8 }
 0x1a1   :  { %v249_v26 = vpop.permute.xlu1 %248 }
 0x1a4   :  { %v276_v29 = vpop.permute.xlu0 %275 }
 0x1a5   :  { %v245_v30 = vpop.permute.xlu1 %244 }
 0x1a8   :  { %v247_v31 = vpop.permute.xlu0 %246 }
 0x1a9   :  { %v251_v25 = vsel %vm250_vm2, %v245_v30, %v247_v31  ;;  %v252_v32 = vsel %vm250_vm2, %v247_v31, %v249_v26  ;;  %v278_v33 = vpop.permute.xlu1 %277 }
 0x1aa   :  { %v256_v34 = vsel %vm240_vm3, %v252_v32, 0.0  ;;  %v255_v35 = vsel %vm239_vm4, %v251_v25, 0.0  ;;  %v282_v36 = vsel %vm281_vm5, %v276_v29, %v278_v33 }
 0x1ab   :  { %261 = vrot.lane.b32.xlu0 %v256_v34, %s545_s1  ;;  %259 = vrot.lane.b32.xlu1 %v255_v35, %s545_s1  ;;  %v286_v40 = vsel %vm270_vm7, %v282_v36, 0.0 }
 0x1ac   :  { %v280_v37 = vpop.permute.xlu0 %279 }
 0x1ad   :  { %v283_v38 = vsel %vm281_vm5, %v278_v33, %v280_v37 }
 0x1ae   :  { %v287_v39 = vsel %vm271_vm6, %v283_v38, 0.0  ;;  %v335_v38 = vstv %s704_s2  ;;  %s551_s2 = smov [#allocation10]  }
 0x1af   :  { %292 = vrot.lane.b32.xlu0 %v287_v39, %s545_s1  ;;  %290 = vrot.lane.b32.xlu1 %v286_v40, %s545_s1  ;;  %s406_s14 = sshll.u32 %s551_s2, 4  ;;  %s407_s14 = int_to_ptr.vmem [resolvable:$true] %s406_s14 }
 0x1b0   :  { %s507_s15 = scalar_lea.vmem %s407_s14, 256  ;;  %p512_p3 = scmp.lt.s32.totalorder %s407_s14, %s407_s14 }
 0x1b1   :  { %p508_p2 = scmp.ne.s32.totalorder %s407_s14, %s507_s15  ;;  %p513_p4 = scmp.lt.s32.totalorder %s507_s15, %s507_s15 }
 0x1b2   :  { %v105_v41 = vpop.permute.xlu0 %104 }
 0x1b3   :  { %p514_p5 = por %p513_p4, %p512_p3 }
 0x1b5   :  { %p515_p6 = pnand %p514_p5, %p508_p2 }
 0x1b9   :  { %v175_v43 = vpop.permute.xlu0 %174 }
 0x1ba   :  { %v59_v42 = vpop.permute.xlu1 %58 }
 0x1bb   :  { %v61_v45 = vmul.f32 %v59_v42, %v606_v11  ;;  %v62_v46 = vmul.f32 %v59_v42, %v614_v15  ;;  %v63_v50 = vmul.f32 %v59_v42, %v609_v12 }
 0x1bd   :  { %v179_v48 = vpop.permute.xlu0 %178  ;;  %v112_v51 = vadd.f32 %v105_v41, %v61_v45 }
 0x1be   :  { %v107_v44 = vpop.permute.xlu1 %106 }
 0x1bf   :  { %v108_v47 = vsel %vm87_vm0, %v105_v41, %v107_v44  ;;  %v185_v56 = vadd.f32 %v175_v43, %v112_v51  ;;  %v114_v57 = vadd.f32 %v107_v44, %v63_v50 }
 0x1c0   :  { %v113_v52 = vadd.f32 %v108_v47, %v62_v46 }
 0x1c2   :  { %v177_v49 = vpop.permute.xlu1 %176 }
 0x1c3   :  { %v180_v53 = vsel %vm155_vm1, %v175_v43, %v177_v49  ;;  %v181_v11 = vsel %vm155_vm1, %v177_v49, %v179_v48 }
 0x1c4   :  { %v186_v59 = vadd.f32 %v180_v53, %v113_v52  ;;  %v187_v63 = vadd.f32 %v181_v11, %v114_v57 }
 0x21d   :  { %v262_v54 = vpop.permute.xlu0 %261  ;;  %v260_v55 = vpop.permute.xlu1 %259 }
 0x21e   :  { %v263_v58 = vsel %vm87_vm0, %v260_v55, %v262_v54  ;;  %v267_v15 = vadd.f32 %v260_v55, %v185_v56  ;;  %v269_v3 = vadd.f32 %v262_v54, %v187_v63 }
 0x21f   :  { %v268_v60 = vadd.f32 %v263_v58, %v186_v59 }
 0x221   :  { %v293_v61 = vpop.permute.xlu0 %292  ;;  %v291_v62 = vpop.permute.xlu1 %290 }
 0x222   :  { %v294_v12 = vsel %vm87_vm0, %v291_v62, %v293_v61  ;;  %v298_v0 = vadd.f32 %v291_v62, %v267_v15  ;;  %v300_v4 = vadd.f32 %v293_v61, %v269_v3 }
 0x223   :  { %v299_v1 = vadd.f32 %v294_v12, %v268_v60 }
 0x224   :  { %304 = vrot.lane.b32.xlu1 %v298_v0, %s550_s11 }
 0x225   :  { %306 = vrot.lane.b32.xlu0 %v299_v1, %s550_s11 }
 0x228   :  { %308 = vrot.lane.b32.xlu1 %v300_v4, %s550_s11 }
 0x296   :  { %v305_v5 = vpop.permute.xlu1 %304 }
 0x297   :  { %v307_v6 = vpop.permute.xlu0 %306 }
 0x298   :  { %v311_v7 = vsel %vm310_vm8, %v305_v5, %v307_v6 }
 0x299   :  { %315 = vst [vmem:[#allocation2] sm:$0xff] %v311_v7 }
 0x29a   :  { %v309_v8 = vpop.permute.xlu1 %308 }
 0x29b   :  { %v312_v9 = vsel %vm310_vm8, %v307_v6, %v309_v8 }
 0x29c   :  { %316 = vst [vmem:[#allocation2 + $0x8] sm:$0xff] %v312_v9 }
 0x2a0   :  { %v317_v14 = vld [vmem:[#allocation2] sm:$0xf]  ;;  %v352_v16 = vld [vmem:[#allocation2] sm:$0xf0] }
 0x2a1   :  { %v320_v17 = vsel %vm319_vm9, %v317_v14, 0.0  ;;  %v356_v18 = vrot.slane %v352_v16, 4 }
 0x2a2   :  { %v321_v19 = vrot.slane %v320_v17, 4 }
 0x2a3   :  { %v360_v20 = vsel %vm319_vm9, %v356_v18, 0.0  ;;  %v318_v21 = vld [vmem:[#allocation2 + $0x8] sm:$0xf]  ;;  %v353_v22 = vld [vmem:[#allocation2 + $0x8] sm:$0xf0] }
 0x2a4   :  { %v322_v2 = vadd.f32 %v321_v19, %v320_v17  ;;  %v361_v23 = vrot.slane %v360_v20, 4  ;;  %v327_v24 = vsel %vm319_vm9, %v318_v21, 0.0  ;;  %v357_v26 = vrot.slane %v353_v22, 4 }
 0x2a5   :  { %v328_v27 = vrot.slane %v327_v24, 4 }
 0x2a6   :  { %v323_v28 = vrot.slane %v322_v2, 2  ;;  %v362_v29 = vadd.f32 %v361_v23, %v360_v20  ;;  %v367_v30 = vsel %vm319_vm9, %v357_v26, 0.0 }
 0x2a7   :  { %v329_v31 = vadd.f32 %v328_v27, %v327_v24  ;;  %v368_v25 = vrot.slane %v367_v30, 4 }
 0x2a8   :  { %v324_v32 = vadd.f32 %v323_v28, %v322_v2  ;;  %v363_v33 = vrot.slane %v362_v29, 2 }
 0x2a9   :  { %v330_v34 = vrot.slane %v329_v31, 2  ;;  %v369_v35 = vadd.f32 %v368_v25, %v367_v30 }
 0x2aa   :  { %v325_v36 = vrot.slane %v324_v32, 1  ;;  %v364_v37 = vadd.f32 %v363_v33, %v362_v29 }
 0x2ab   :  { %v331_v39 = vadd.f32 %v330_v34, %v329_v31  ;;  %v370_v40 = vrot.slane %v369_v35, 2 }
 0x2ac   :  { %v326_v41 = vadd.f32 %v325_v36, %v324_v32  ;;  %v365_v42 = vrot.slane %v364_v37, 1 }
 0x2ad   :  { %v332_v43 = vrot.slane %v331_v39, 1  ;;  %v371_v44 = vadd.f32 %v370_v40, %v369_v35 }
 0x2ae   :  { %v336_v45 = vadd.f32 %v335_v38, %v326_v41  ;;  %v366_v46 = vadd.f32 %v365_v42, %v364_v37 }
 0x2af   :  { %v333_v47 = vadd.f32 %v332_v43, %v331_v39  ;;  %v372_v48 = vrot.slane %v371_v44, 1 }
 0x2b0   :  { %v416_v49 = vmul.f32 -1.442695, %v336_v45  ;;  %v376_v50 = vadd.f32 %v366_v46, %v335_v38 }
 0x2b1   :  { %v337_v51 = vadd.f32 %v335_v38, %v333_v47  ;;  %v373_v52 = vadd.f32 %v372_v48, %v371_v44 }
 0x2b2   :  { %447 = vpow2.f32 %v416_v49  ;;  %v418_v53 = vmul.f32 -1.442695, %v376_v50 }
 0x2b3   :  { %v417_v54 = vmul.f32 -1.442695, %v337_v51  ;;  %v377_v55 = vadd.f32 %v373_v52, %v335_v38 }
 0x2b4   :  { %449 = vpow2.f32 %v418_v53 }
 0x2b5   :  { %451 = vpow2.f32 %v417_v54  ;;  %v419_v56 = vmul.f32 -1.442695, %v377_v55 }
 0x2b7   :  { %453 = vpow2.f32 %v419_v56 }
 0x2bc   :  { %v448_v57 = vpop.eup %447 }
 0x2bd   :  { %v344_v58 = vadd.f32 1.0, %v448_v57 }
 0x2be   :  { %v450_v11 = vpop.eup %449 }
 0x2bf   :  { %v452_v59 = vpop.eup %451  ;;  %455 = vrcp.f32 %v344_v58  ;;  %v384_v15 = vadd.f32 1.0, %v450_v11 }
 0x2c0   :  { %v345_v60 = vadd.f32 1.0, %v452_v59 }
 0x2c1   :  { %v454_v61 = vpop.eup %453  ;;  %457 = vrcp.f32 %v384_v15 }
 0x2c2   :  { %459 = vrcp.f32 %v345_v60  ;;  %v385_v62 = vadd.f32 1.0, %v454_v61 }
 0x2c4   :  { %461 = vrcp.f32 %v385_v62 }
 0x2c9   :  { %v456_v63 = vpop.eup %455 }
 0x2ca   :  { %350 = vst [vmem:[#allocation3] sm:$0xf] %v456_v63 }
 0x2cb   :  { %v458_v12 = vpop.eup %457 }
 0x2cc   :  { %v460_v0 = vpop.eup %459  ;;  %390 = vst [vmem:[#allocation3] sm:$0xf0] %v458_v12 }
 0x2cd   :  { %351 = vst [vmem:[#allocation3 + $0x8] sm:$0xf] %v460_v0 }
 0x2ce   :  { %v462_v1 = vpop.eup %461 }
 0x2cf   :  { %391 = vst [vmem:[#allocation3 + $0x8] sm:$0xf0] %v462_v1 }
 0x2d3   :  { %v394_v3 = vld [vmem:[#allocation3] sm:$0xff] }
 0x2d4   :  { %v396_v4 = vmul.f32 %v394_v3, %v611_v13 }
 0x2d6   :  { %v395_v5 = vld [vmem:[#allocation3 + $0x8] sm:$0xff]  ;;  %398 = vst [vmem:[#allocation10] sm:$0xff] %v396_v4 }
 0x2d7   :  { %v397_v6 = vmul.f32 %v395_v5, %v604_v10 }
 0x2d9   :  { %399 = vst [vmem:[#allocation10 + $0x8] sm:$0xff] %v397_v6 }
 0x2da   :  { %518 = shalt.err (!%p515_p6)
}
 0x2db   :  { %s519_s18 = scalar_lea.hbm %s705_s3, 256 }
 0x2dc   :  { %p520_p7 = scmp.ne.s32.totalorder %s705_s3, %s519_s18  ;;  %p523_p8 = scmp.lt.u32.totalorder %s519_s18, %s705_s3 }
 0x2de   :  { %p525_p9 = pnand %p523_p8, %p520_p7 }
 0x2e0   :  { %528 = shalt.err (!%p525_p9)
}
 0x2e1   :  { %409 = dma.vmem_to_hbm [thread:$0]  %s407_s14, 256, %s705_s3, [#allocation7]  }
 0x2e2   :  { %533 = dma.done.wait [#allocation7], 256  }
 0x2e3   :  { %534 = vsyncadd [#allocation7], 4294967040 }
 0x2e4   :  { %413 = vsyncpa [#allocation6], 1 }
 0x2e5   :  { %414 = vsyncpa [#allocation9], 1 }
 0x2e6   :  { %415 = vsyncpa [#allocation7], 1 }

</bundles_post_ra>
